<compile_context>
chip_gen: v7x
topology: tpu7x:2x2x1
jax: 0.10.0
libtpu: 0.0.40
codegen_flags: <defaults>
</compile_context>

<pallas_src>
import functools

import jax
import jax.numpy as jnp
from jax import lax
from jax.experimental import pallas as pl
from jax.experimental.pallas import tpu as pltpu


def _prompt_kernel(name_lens_ref, prefix_ref, ctx_ref, suffix_ref, out_ref,
                   *, n_ctx, half, suffix_len, batch):
    """Builds `batch` prompts per grid step:
       [prefix, ctx[:half], suffix[:nl], ctx[half:], suffix[nl:]]  per class.
    """
    c2 = n_ctx - half
    g = pl.program_id(0)
    odt = out_ref.dtype

    # ---------- static placements (shared across the B classes) ------------
    # row 0: SOS / prefix token
    out_ref[:, 0:1, :] = prefix_ref[...].astype(odt)

    # rows [1, 1+half): first half of the (shared) learned context
    if half > 0:
        ctx1 = ctx_ref[0:half, :].astype(odt)                       # (half, D)
        out_ref[:, 1:1 + half, :] = jnp.broadcast_to(
            ctx1[None], (batch, half, ctx1.shape[-1]))

    # rows [1+half, 1+half+S): park the full suffix right after ctx half 1.
    # This is already correct for the first `nl` rows of each class (the class
    # name tokens); the rest is fixed up below and/or overwritten by ctx2.
    suffix = suffix_ref[...]                                        # (B, S, D)
    out_ref[:, 1 + half:1 + half + suffix_len, :] = suffix.astype(odt)

    # ---------- data-dependent placements (per class) -----------------------
    ctx2 = ctx_ref[half:, :].astype(odt)                            # (c2, D)
    s_iota = lax.broadcasted_iota(jnp.int32, (suffix_len, 1), 0)    # (S, 1)

    for b in range(batch):                                          # B small & static
        nl = name_lens_ref[g * batch + b]                           # SMEM scalar

        # rows [1+n_ctx, seq_len): suffix row s belongs at 1+n_ctx+s iff s >= nl
        # (trailing EOS/pad part).  Blend against what is already there so the
        # class-name rows placed above are preserved; any row kept from `cur`
        # that was not yet written lies in the ctx2 region and is overwritten
        # right after.
        cur = out_ref[b, 1 + n_ctx:, :]                             # (S, D)
        out_ref[b, 1 + n_ctx:, :] = jnp.where(
            s_iota >= nl, suffix[b].astype(odt), cur)

        # rows [1+half+nl, 1+half+nl+c2): second half of the context at a
        # per-class dynamic offset.
        if c2 > 0:
            out_ref[b, pl.ds(1 + half + nl, c2), :] = ctx2


def prompt_learner_forward(ctx, token_prefix, token_suffix, name_lens,
                           *, class_batch=None):
    """ctx: (n_ctx, D); token_prefix: (n_cls, 1, D); token_suffix: (n_cls, S, D);
    name_lens: (n_cls,) ints.  Returns (n_cls, 1 + n_ctx + S, D)."""
    n_ctx, D = ctx.shape
    n_cls = token_prefix.shape[0]
    suffix_len = token_suffix.shape[1]
    seq_len = 1 + n_ctx + suffix_len
    half = n_ctx // 2

    if class_batch is None:
        # ~16 classes/step keeps the double-buffered working set well under the
        # scoped-VMEM defaults on v5e/v6e/v7x for CLIP-sized D (f32 or bf16).
        class_batch = 16
    B = max(1, min(class_batch, n_cls))
    n_pad = -(-n_cls // B) * B
    pad = n_pad - n_cls

    # Clamp name lengths: there is no runtime bounds check on TPU, so a bad
    # length must not be able to index past the suffix / output block.
    name_lens = jnp.clip(jnp.asarray(name_lens, dtype=jnp.int32), 0, suffix_len)
    if pad:
        token_prefix = jnp.pad(token_prefix, ((0, pad), (0, 0), (0, 0)))
        token_suffix = jnp.pad(token_suffix, ((0, pad), (0, 0), (0, 0)))
        name_lens = jnp.pad(name_lens, (0, pad))

    kernel = functools.partial(
        _prompt_kernel, n_ctx=n_ctx, half=half,
        suffix_len=suffix_len, batch=B)

    grid_spec = pltpu.PrefetchScalarGridSpec(
        num_scalar_prefetch=1,
        grid=(n_pad // B,),
        in_specs=[
            pl.BlockSpec((B, 1, D), lambda g, nl: (g, 0, 0)),            # prefix
            pl.BlockSpec((n_ctx, D), lambda g, nl: (0, 0)),              # shared ctx
            pl.BlockSpec((B, suffix_len, D), lambda g, nl: (g, 0, 0)),   # suffix
        ],
        out_specs=pl.BlockSpec((B, seq_len, D), lambda g, nl: (g, 0, 0)),
    )

    out = pl.pallas_call(
        kernel,
        out_shape=jax.ShapeDtypeStruct((n_pad, seq_len, D), ctx.dtype),
        grid_spec=grid_spec,
        compiler_params=pltpu.CompilerParams(
            dimension_semantics=("parallel",),
            vmem_limit_bytes=32 * 1024 * 1024,
        ),
    )(name_lens, token_prefix, ctx, token_suffix)

    return out[:n_cls] if pad else out


def _reference(ctx, prefix, suffix, name_lens, n_ctx):
    """Pure-JAX mirror of the PyTorch 'middle' branch."""
    half = n_ctx // 2
    outs = []
    for i in range(prefix.shape[0]):
        nl = int(name_lens[i])
        outs.append(jnp.concatenate(
            [prefix[i], ctx[:half], suffix[i, :nl], ctx[half:], suffix[i, nl:]],
            axis=0))
    return jnp.stack(outs, axis=0)


if __name__ == "__main__":
    # Small synthetic config consistent with the module: n_cls classes, n_ctx
    # context tokens ("a photo of a" -> 4), lane-aligned embedding dim D,
    # seq_len = 1 + n_ctx + suffix_len.
    n_cls, n_ctx, D = 6, 4, 128
    suffix_len = 11
    seq_len = 1 + n_ctx + suffix_len

    key = jax.random.PRNGKey(0)
    k_ctx, k_pre, k_suf = jax.random.split(key, 3)

    # Deterministic stand-ins for clip_model.token_embedding outputs.
    ctx = jax.random.normal(k_ctx, (n_ctx, D), dtype=jnp.float32)          # self.ctx
    token_prefix = jax.random.normal(k_pre, (n_cls, 1, D), dtype=jnp.float32)
    token_suffix = jax.random.normal(k_suf, (n_cls, suffix_len, D), dtype=jnp.float32)
    name_lens = jnp.array([1, 2, 3, 2, 4, 1], dtype=jnp.int32)             # per-class name lengths

    # class_batch=4 exercises class batching + the n_cls % B != 0 padding path.
    prompts = prompt_learner_forward(ctx, token_prefix, token_suffix, name_lens,
                                     class_batch=4)
    prompts = jax.block_until_ready(prompts)

    ref = _reference(ctx, token_prefix, token_suffix, name_lens, n_ctx)
    assert prompts.shape == (n_cls, seq_len, D)
    assert prompts.dtype == ctx.dtype
    # Pure row copies / selects inside the kernel -> bit-exact vs the concat.
    assert jnp.array_equal(prompts, ref)

    print("KERNEL_OK")
</pallas_src>

<mosaic_0001>
module attributes {stable_mosaic.version = 11 : i64} {
  func.func @_prompt_kernel(%arg0: i32, %arg1: memref<8xi32, #tpu.memory_space<smem>>, %arg2: memref<4x1x128xf32, #tpu.memory_space<vmem>>, %arg3: memref<4x128xf32, #tpu.memory_space<vmem>>, %arg4: memref<4x11x128xf32, #tpu.memory_space<vmem>>, %arg5: memref<4x16x128xf32, #tpu.memory_space<vmem>>) attributes {dimension_semantics = [#tpu.dimension_semantics<parallel>], iteration_bounds = array<i64: 2>, scalar_prefetch = 1 : i64, scratch_operands = 0 : i64, tpu.core_type = #tpu.core_type<tc>, window_params = [{transform_indices = @transform_0, window_bounds = array<i64: 4, 1, 128>}, {pipeline_mode = #tpu.pipeline_mode<synchronous>, transform_indices = @transform_1, window_bounds = array<i64: 4, 128>}, {transform_indices = @transform_2, window_bounds = array<i64: 4, 11, 128>}, {transform_indices = @transform_3, window_bounds = array<i64: 4, 16, 128>}]} {
    %c0 = arith.constant 0 : index
    %c0_0 = arith.constant 0 : index
    %c0_1 = arith.constant 0 : index
    %0 = vector.load %arg2[%c0, %c0_0, %c0_1] : memref<4x1x128xf32, #tpu.memory_space<vmem>>, vector<4x1x128xf32>
    %c0_2 = arith.constant 0 : index
    %c0_3 = arith.constant 0 : index
    %c0_4 = arith.constant 0 : index
    %1 = vector.load %arg5[%c0_2, %c0_3, %c0_4] : memref<4x16x128xf32, #tpu.memory_space<vmem>>, vector<4x1x128xf32>
    tpu.vector_store %arg5[%c0_2, %c0_3, %c0_4], %0 {strides = array<i32>} : memref<4x16x128xf32, #tpu.memory_space<vmem>>, vector<4x1x128xf32>,
    %c0_5 = arith.constant 0 : index
    %c0_6 = arith.constant 0 : index
    %2 = vector.load %arg3[%c0_5, %c0_6] : memref<4x128xf32, #tpu.memory_space<vmem>>, vector<2x128xf32>
    %3 = vector.shape_cast %2 : vector<2x128xf32> to vector<1x2x128xf32>
    %4 = vector.shape_cast %3 : vector<1x2x128xf32> to vector<1x2x128xf32>
    %5 = vector.broadcast %4 : vector<1x2x128xf32> to vector<4x2x128xf32>
    %c0_7 = arith.constant 0 : index
    %c1 = arith.constant 1 : index
    %c0_8 = arith.constant 0 : index
    %6 = vector.load %arg5[%c0_7, %c1, %c0_8] : memref<4x16x128xf32, #tpu.memory_space<vmem>>, vector<4x2x128xf32>
    tpu.vector_store %arg5[%c0_7, %c1, %c0_8], %5 {strides = array<i32>} : memref<4x16x128xf32, #tpu.memory_space<vmem>>, vector<4x2x128xf32>,
    %c0_9 = arith.constant 0 : index
    %c0_10 = arith.constant 0 : index
    %c0_11 = arith.constant 0 : index
    %7 = vector.load %arg4[%c0_9, %c0_10, %c0_11] : memref<4x11x128xf32, #tpu.memory_space<vmem>>, vector<4x11x128xf32>
    %c0_12 = arith.constant 0 : index
    %c3 = arith.constant 3 : index
    %c0_13 = arith.constant 0 : index
    %8 = vector.load %arg5[%c0_12, %c3, %c0_13] : memref<4x16x128xf32, #tpu.memory_space<vmem>>, vector<4x11x128xf32>
    tpu.vector_store %arg5[%c0_12, %c3, %c0_13], %7 {strides = array<i32>} : memref<4x16x128xf32, #tpu.memory_space<vmem>>, vector<4x11x128xf32>,
    %c2 = arith.constant 2 : index
    %c0_14 = arith.constant 0 : index
    %9 = vector.load %arg3[%c2, %c0_14] : memref<4x128xf32, #tpu.memory_space<vmem>>, vector<2x128xf32>
    %10 = tpu.iota {dimensions = array<i32: 0>} : vector<11x1xi32>
    %c4_i32 = arith.constant 4 : i32
    %11 = arith.muli %arg0, %c4_i32 : i32
    %c0_i32 = arith.constant 0 : i32
    %12 = arith.addi %11, %c0_i32 : i32
    %13 = arith.index_cast %12 : i32 to index
    %14 = memref.load %arg1[%13] : memref<8xi32, #tpu.memory_space<smem>>
    %c0_15 = arith.constant 0 : index
    %c5 = arith.constant 5 : index
    %c0_16 = arith.constant 0 : index
    %15 = vector.load %arg5[%c0_15, %c5, %c0_16] : memref<4x16x128xf32, #tpu.memory_space<vmem>>, vector<1x11x128xf32>
    %16 = vector.shape_cast %15 : vector<1x11x128xf32> to vector<11x128xf32>
    %17 = vector.broadcast %14 : i32 to vector<11x1xi32>
    %18 = arith.cmpi sge, %10, %17 : vector<11x1xi32>
    %19 = vector.extract_strided_slice %7 {offsets = [0, 0, 0], sizes = [1, 11, 128], strides = [1, 1, 1]} : vector<4x11x128xf32> to vector<1x11x128xf32>
    %20 = vector.shape_cast %19 : vector<1x11x128xf32> to vector<11x128xf32>
    %21 = vector.shape_cast %18 : vector<11x1xi1> to vector<11x1xi1>
    %22 = vector.broadcast %21 : vector<11x1xi1> to vector<11x128xi1>
    %23 = arith.select %22, %20, %16 : vector<11x128xi1>, vector<11x128xf32>
    %c0_17 = arith.constant 0 : index
    %c5_18 = arith.constant 5 : index
    %c0_19 = arith.constant 0 : index
    %24 = vector.load %arg5[%c0_17, %c5_18, %c0_19] : memref<4x16x128xf32, #tpu.memory_space<vmem>>, vector<1x11x128xf32>
    %25 = vector.shape_cast %24 : vector<1x11x128xf32> to vector<11x128xf32>
    %26 = vector.shape_cast %23 : vector<11x128xf32> to vector<1x11x128xf32>
    tpu.vector_store %arg5[%c0_17, %c5_18, %c0_19], %26 {strides = array<i32>} : memref<4x16x128xf32, #tpu.memory_space<vmem>>, vector<1x11x128xf32>,
    %c3_i32 = arith.constant 3 : i32
    %27 = arith.addi %c3_i32, %14 : i32
    %c0_20 = arith.constant 0 : index
    %28 = arith.index_cast %27 : i32 to index
    %c0_21 = arith.constant 0 : index
    %29 = vector.load %arg5[%c0_20, %28, %c0_21] : memref<4x16x128xf32, #tpu.memory_space<vmem>>, vector<1x2x128xf32>
    %30 = vector.shape_cast %29 : vector<1x2x128xf32> to vector<2x128xf32>
    %31 = vector.shape_cast %9 : vector<2x128xf32> to vector<1x2x128xf32>
    tpu.vector_store %arg5[%c0_20, %28, %c0_21], %31 {strides = array<i32>} : memref<4x16x128xf32, #tpu.memory_space<vmem>>, vector<1x2x128xf32>,
    %c4_i32_22 = arith.constant 4 : i32
    %32 = arith.muli %arg0, %c4_i32_22 : i32
    %c1_i32 = arith.constant 1 : i32
    %33 = arith.addi %32, %c1_i32 : i32
    %34 = arith.index_cast %33 : i32 to index
    %35 = memref.load %arg1[%34] : memref<8xi32, #tpu.memory_space<smem>>
    %c1_23 = arith.constant 1 : index
    %c5_24 = arith.constant 5 : index
    %c0_25 = arith.constant 0 : index
    %36 = vector.load %arg5[%c1_23, %c5_24, %c0_25] : memref<4x16x128xf32, #tpu.memory_space<vmem>>, vector<1x11x128xf32>
    %37 = vector.shape_cast %36 : vector<1x11x128xf32> to vector<11x128xf32>
    %38 = vector.broadcast %35 : i32 to vector<11x1xi32>
    %39 = arith.cmpi sge, %10, %38 : vector<11x1xi32>
    %40 = vector.extract_strided_slice %7 {offsets = [1, 0, 0], sizes = [1, 11, 128], strides = [1, 1, 1]} : vector<4x11x128xf32> to vector<1x11x128xf32>
    %41 = vector.shape_cast %40 : vector<1x11x128xf32> to vector<11x128xf32>
    %42 = vector.shape_cast %39 : vector<11x1xi1> to vector<11x1xi1>
    %43 = vector.broadcast %42 : vector<11x1xi1> to vector<11x128xi1>
    %44 = arith.select %43, %41, %37 : vector<11x128xi1>, vector<11x128xf32>
    %c1_26 = arith.constant 1 : index
    %c5_27 = arith.constant 5 : index
    %c0_28 = arith.constant 0 : index
    %45 = vector.load %arg5[%c1_26, %c5_27, %c0_28] : memref<4x16x128xf32, #tpu.memory_space<vmem>>, vector<1x11x128xf32>
    %46 = vector.shape_cast %45 : vector<1x11x128xf32> to vector<11x128xf32>
    %47 = vector.shape_cast %44 : vector<11x128xf32> to vector<1x11x128xf32>
    tpu.vector_store %arg5[%c1_26, %c5_27, %c0_28], %47 {strides = array<i32>} : memref<4x16x128xf32, #tpu.memory_space<vmem>>, vector<1x11x128xf32>,
    %c3_i32_29 = arith.constant 3 : i32
    %48 = arith.addi %c3_i32_29, %35 : i32
    %c1_30 = arith.constant 1 : index
    %49 = arith.index_cast %48 : i32 to index
    %c0_31 = arith.constant 0 : index
    %50 = vector.load %arg5[%c1_30, %49, %c0_31] : memref<4x16x128xf32, #tpu.memory_space<vmem>>, vector<1x2x128xf32>
    %51 = vector.shape_cast %50 : vector<1x2x128xf32> to vector<2x128xf32>
    %52 = vector.shape_cast %9 : vector<2x128xf32> to vector<1x2x128xf32>
    tpu.vector_store %arg5[%c1_30, %49, %c0_31], %52 {strides = array<i32>} : memref<4x16x128xf32, #tpu.memory_space<vmem>>, vector<1x2x128xf32>,
    %c4_i32_32 = arith.constant 4 : i32
    %53 = arith.muli %arg0, %c4_i32_32 : i32
    %c2_i32 = arith.constant 2 : i32
    %54 = arith.addi %53, %c2_i32 : i32
    %55 = arith.index_cast %54 : i32 to index
    %56 = memref.load %arg1[%55] : memref<8xi32, #tpu.memory_space<smem>>
    %c2_33 = arith.constant 2 : index
    %c5_34 = arith.constant 5 : index
    %c0_35 = arith.constant 0 : index
    %57 = vector.load %arg5[%c2_33, %c5_34, %c0_35] : memref<4x16x128xf32, #tpu.memory_space<vmem>>, vector<1x11x128xf32>
    %58 = vector.shape_cast %57 : vector<1x11x128xf32> to vector<11x128xf32>
    %59 = vector.broadcast %56 : i32 to vector<11x1xi32>
    %60 = arith.cmpi sge, %10, %59 : vector<11x1xi32>
    %61 = vector.extract_strided_slice %7 {offsets = [2, 0, 0], sizes = [1, 11, 128], strides = [1, 1, 1]} : vector<4x11x128xf32> to vector<1x11x128xf32>
    %62 = vector.shape_cast %61 : vector<1x11x128xf32> to vector<11x128xf32>
    %63 = vector.shape_cast %60 : vector<11x1xi1> to vector<11x1xi1>
    %64 = vector.broadcast %63 : vector<11x1xi1> to vector<11x128xi1>
    %65 = arith.select %64, %62, %58 : vector<11x128xi1>, vector<11x128xf32>
    %c2_36 = arith.constant 2 : index
    %c5_37 = arith.constant 5 : index
    %c0_38 = arith.constant 0 : index
    %66 = vector.load %arg5[%c2_36, %c5_37, %c0_38] : memref<4x16x128xf32, #tpu.memory_space<vmem>>, vector<1x11x128xf32>
    %67 = vector.shape_cast %66 : vector<1x11x128xf32> to vector<11x128xf32>
    %68 = vector.shape_cast %65 : vector<11x128xf32> to vector<1x11x128xf32>
    tpu.vector_store %arg5[%c2_36, %c5_37, %c0_38], %68 {strides = array<i32>} : memref<4x16x128xf32, #tpu.memory_space<vmem>>, vector<1x11x128xf32>,
    %c3_i32_39 = arith.constant 3 : i32
    %69 = arith.addi %c3_i32_39, %56 : i32
    %c2_40 = arith.constant 2 : index
    %70 = arith.index_cast %69 : i32 to index
    %c0_41 = arith.constant 0 : index
    %71 = vector.load %arg5[%c2_40, %70, %c0_41] : memref<4x16x128xf32, #tpu.memory_space<vmem>>, vector<1x2x128xf32>
    %72 = vector.shape_cast %71 : vector<1x2x128xf32> to vector<2x128xf32>
    %73 = vector.shape_cast %9 : vector<2x128xf32> to vector<1x2x128xf32>
    tpu.vector_store %arg5[%c2_40, %70, %c0_41], %73 {strides = array<i32>} : memref<4x16x128xf32, #tpu.memory_space<vmem>>, vector<1x2x128xf32>,
    %c4_i32_42 = arith.constant 4 : i32
    %74 = arith.muli %arg0, %c4_i32_42 : i32
    %c3_i32_43 = arith.constant 3 : i32
    %75 = arith.addi %74, %c3_i32_43 : i32
    %76 = arith.index_cast %75 : i32 to index
    %77 = memref.load %arg1[%76] : memref<8xi32, #tpu.memory_space<smem>>
    %c3_44 = arith.constant 3 : index
    %c5_45 = arith.constant 5 : index
    %c0_46 = arith.constant 0 : index
    %78 = vector.load %arg5[%c3_44, %c5_45, %c0_46] : memref<4x16x128xf32, #tpu.memory_space<vmem>>, vector<1x11x128xf32>
    %79 = vector.shape_cast %78 : vector<1x11x128xf32> to vector<11x128xf32>
    %80 = vector.broadcast %77 : i32 to vector<11x1xi32>
    %81 = arith.cmpi sge, %10, %80 : vector<11x1xi32>
    %82 = vector.extract_strided_slice %7 {offsets = [3, 0, 0], sizes = [1, 11, 128], strides = [1, 1, 1]} : vector<4x11x128xf32> to vector<1x11x128xf32>
    %83 = vector.shape_cast %82 : vector<1x11x128xf32> to vector<11x128xf32>
    %84 = vector.shape_cast %81 : vector<11x1xi1> to vector<11x1xi1>
    %85 = vector.broadcast %84 : vector<11x1xi1> to vector<11x128xi1>
    %86 = arith.select %85, %83, %79 : vector<11x128xi1>, vector<11x128xf32>
    %c3_47 = arith.constant 3 : index
    %c5_48 = arith.constant 5 : index
    %c0_49 = arith.constant 0 : index
    %87 = vector.load %arg5[%c3_47, %c5_48, %c0_49] : memref<4x16x128xf32, #tpu.memory_space<vmem>>, vector<1x11x128xf32>
    %88 = vector.shape_cast %87 : vector<1x11x128xf32> to vector<11x128xf32>
    %89 = vector.shape_cast %86 : vector<11x128xf32> to vector<1x11x128xf32>
    tpu.vector_store %arg5[%c3_47, %c5_48, %c0_49], %89 {strides = array<i32>} : memref<4x16x128xf32, #tpu.memory_space<vmem>>, vector<1x11x128xf32>,
    %c3_i32_50 = arith.constant 3 : i32
    %90 = arith.addi %c3_i32_50, %77 : i32
    %c3_51 = arith.constant 3 : index
    %91 = arith.index_cast %90 : i32 to index
    %c0_52 = arith.constant 0 : index
    %92 = vector.load %arg5[%c3_51, %91, %c0_52] : memref<4x16x128xf32, #tpu.memory_space<vmem>>, vector<1x2x128xf32>
    %93 = vector.shape_cast %92 : vector<1x2x128xf32> to vector<2x128xf32>
    %94 = vector.shape_cast %9 : vector<2x128xf32> to vector<1x2x128xf32>
    tpu.vector_store %arg5[%c3_51, %91, %c0_52], %94 {strides = array<i32>} : memref<4x16x128xf32, #tpu.memory_space<vmem>>, vector<1x2x128xf32>,
    return
  }
  func.func @transform_0(%arg0: i32, %arg1: memref<8xi32, #tpu.memory_space<smem>>) -> (i32, i32, i32) {
    %c0_i32 = arith.constant 0 : i32
    %c0_i32_0 = arith.constant 0 : i32
    %c0_i32_1 = arith.constant 0 : i32
    return %arg0, %c0_i32, %c0_i32_0 : i32, i32, i32
  }
  func.func @transform_1(%arg0: i32, %arg1: memref<8xi32, #tpu.memory_space<smem>>) -> (i32, i32) {
    %c0_i32 = arith.constant 0 : i32
    %c0_i32_0 = arith.constant 0 : i32
    %c0_i32_1 = arith.constant 0 : i32
    return %c0_i32, %c0_i32_0 : i32, i32
  }
  func.func @transform_2(%arg0: i32, %arg1: memref<8xi32, #tpu.memory_space<smem>>) -> (i32, i32, i32) {
    %c0_i32 = arith.constant 0 : i32
    %c0_i32_0 = arith.constant 0 : i32
    %c0_i32_1 = arith.constant 0 : i32
    return %arg0, %c0_i32, %c0_i32_0 : i32, i32, i32
  }
  func.func @transform_3(%arg0: i32, %arg1: memref<8xi32, #tpu.memory_space<smem>>) -> (i32, i32, i32) {
    %c0_i32 = arith.constant 0 : i32
    %c0_i32_0 = arith.constant 0 : i32
    %c0_i32_1 = arith.constant 0 : i32
    return %arg0, %c0_i32, %c0_i32_0 : i32, i32, i32
  }
}

</mosaic_0001>

<bundles_post_ra>
// kernel: tpu_custom_call.1
= control target key start
LH: loop header
LB: loop body
LE: loop exit
PB: predicated region body
PF: predicated region fallthrough
CT: control target
= control target key end

     0   :  { %s766_s0 = inlined_call_operand.vmem [shape: s32[8], index: 0, kind: input, shape index: {}]   ;;  %s767_s1 = inlined_call_operand.vmem [shape: f32[8,1,128], index: 1, kind: input, shape index: {}]   ;;  %s768_s2 = inlined_call_operand.vmem [shape: f32[4,128], index: 2, kind: input, shape index: {}]   ;;  %s769_s3 = inlined_call_operand.vmem [shape: f32[8,11,128], index: 3, kind: input, shape index: {}]   ;;  %s770_s4 = inlined_call_operand.hbm [shape: f32[8,16,128], index: 4, kind: output, shape index: {}]  }
   0x1   :  { %s9_s17 = sshll.u32 %s766_s0, 4  ;;  %s10_s17 = int_to_ptr.vmem [resolvable:$true] %s9_s17 }
   0x2   :  { %s483_s18 = scalar_lea.vmem %s10_s17, 16  ;;  %p488_p1 = scmp.lt.s32.totalorder %s10_s17, %s10_s17 }
   0x3   :  { %p484_p0 = scmp.ne.s32.totalorder %s10_s17, %s483_s18  ;;  %p489_p2 = scmp.lt.s32.totalorder %s483_s18, %s483_s18 }
   0x5   :  { %p490_p3 = por %p489_p2, %p488_p1 }
   0x7   :  { %p491_p4 = pnand %p490_p3, %p484_p0 }
   0x9   :  { %494 = shalt.err (!%p491_p4)  }
   0xa   :  { %s561_s19 = smov [#allocation3]  }
   0xb   :  { %12 = dma.vmem_to_smem %s10_s17, 16, %s561_s19, [#allocation2] }
   0xc   :  { %539 = dma.done.wait [#allocation2], 16 }
   0xd   :  { %540 = vsyncadd [#allocation2], 4294967280 }
   0xe   :  { %14 = sfence }
   0xf   :  { %15 = vsyncpa [#allocation5], 0 }
  0x10   :  { %17 = vsyncpa [#allocation5 + $0x1], 0  ;;  %s593_s20 = smov 0   ;;  %s595_s21 = smov 0  }
  0x11   :  { %s597_s0 = smov 0   ;;  %s599_s22 = smov 0  }
  0x12 LB: > { %s614_s23 = sadd.s32 4294967295, %s559_s22   ;;  %s406_s24 = sadd.s32 4294967294, %s559_s22   ;;  %s559_s22 = sphi %s599_s22, %s776_s22   ;;  %s555_s0 = sphi %s597_s0, %s775_s0   ;;  %s551_s21 = sphi %s595_s21, %s774_s21   ;;  %s547_s20 = sphi %s593_s20, %s773_s20  }
  0x13   : > { %s618_s25 = sadd.s32 1, %s559_s22   ;;  %s103_s26 = sadd.s32 1, %s555_s0 }
  0x14   : > { %s100_s27 = ssub.s32 %s559_s22, %s618_s25  ;;  %p113_p5 = scmp.ne.s32.totalorder %s555_s0, %s551_s21 }
  0x15   : > { %p101_p6 = scmp.eq.s32.totalorder %s100_s27, 0  ;;  %p114_p7 = scmp.eq.s32.totalorder %s614_s23, 1 }
  0x16   : > { %p119_p8 = scmp.ne.s32.totalorder %s551_s21, %s547_s20  ;;  %p120_p9 = scmp.eq.s32.totalorder %s406_s24, 1 }
  0x17   : > { %s629_s28 = scalar_select %p101_p6, %s555_s0, %s103_s26  }
  0x18   : > { %p631_p10 = por %p114_p7, %p113_p5  ;;  %p635_p11 = por %p120_p9, %p119_p8 }
  0x19   : > { %p409_p12 = scmp.ge.s32.totalorder %s559_s22, 1  ;;  %p159_p13 = scmp.lt.s32.totalorder %s559_s22, 3 }
  0x1b   : > { %p160_p0 = pnand %p409_p12, %p159_p13 }
  0x1c   : > { %s185_s5 = sand.u32 (!%p160_p0), 1, %s551_s21   ;;  %s643_s6 = sshll.u32 (!%p160_p0), %s614_s23, 2  ;;  %v231_v0 = vlaneseq (!%p160_p0)  ;;  %v209_v1 = vld [vmem:[%s768_s2] sm:$0x3] (!%p160_p0)  ;;  %v230_v19 = vld [vmem:[%s768_s2 + $0x2] sm:$0x3] (!%p160_p0) }
  0x1d   : > { %163 = sbr.rel (%p160_p0) target bundleno = 97 (0x61), region = 32  ;;  %s410_s9 = sshll.u32 (!%p160_p0), %s185_s5, 6 }
  0x1e   : > { %p189_p1 = scmp.lt.s32.totalorder (!%p160_p0), %s643_s6, 7  ;;  %s652_s10 = sld [smem:[#allocation3 + %s643_s6]] (!%p160_p0)  ;;  %v661_v2 = vshrl.u32 (!%p160_p0), %v231_v0, 7 }
  0x1f   : > { %s655_s12 = scalar_lea.vmem (!%p160_p0), [#allocation4], %s410_s9  ;;  %s252_s24 = sadd.s32 (!%p160_p0), 1, %s643_s6 }
  0x20   : > { %210 = vst [vmem:[%s655_s12 + $0x1] sm:$0x3] (!%p160_p0), %v209_v1  ;;  %211 = vst [vmem:[%s655_s12 + $0x11] sm:$0x3] (!%p160_p0), %v209_v1  ;;  %v233_v9 = vadd.s32 (!%p160_p0), 8, %v661_v2  ;;  %s253_s26 = sld [smem:[#allocation3 + %s252_s24]] (!%p160_p0) }
  0x21   : > { %212 = vst [vmem:[%s655_s12 + $0x21] sm:$0x3] (!%p160_p0), %v209_v1  ;;  %213 = vst [vmem:[%s655_s12 + $0x31] sm:$0x3] (!%p160_p0), %v209_v1  ;;  %s272_s9 = sadd.s32 (!%p160_p0), 2, %s643_s6 }
  0x24   : > { %s190_s11 = scalar_select %p189_p1, %s643_s6, 7  ;;  %v238_v16 = vstv %s652_s10 }
  0x25   : > { %vm239_vm0 = vcmp.ge.s32.totalorder %v661_v2, %v238_v16  ;;  %vm240_vm1 = vcmp.ge.s32.totalorder %v233_v9, %v238_v16  ;;  %s363_s27 = scalar_lea.vmem %s655_s12, %s652_s10 [#allocation4] }
  0x26   : > { %s438_s13 = sshll.u32 %s190_s11, 4  ;;  %s191_s16 = scalar_lea.vmem %s767_s1, %s190_s11  ;;  %v257_v22 = vstv %s253_s26 }
  0x27   : > { %s198_s19 = scalar_lea.vmem %s769_s3, %s438_s13  ;;  %v201_v3 = vld [vmem:[%s191_s16] sm:$0x1]  ;;  %v202_v4 = vld [vmem:[%s191_s16 + $0x1] sm:$0x1]  ;;  %v203_v5 = vld [vmem:[%s191_s16 + $0x2] sm:$0x1]  ;;  %vm258_vm2 = vcmp.ge.s32.totalorder %v661_v2, %v257_v22  ;;  %vm259_vm3 = vcmp.ge.s32.totalorder %v233_v9, %v257_v22  ;;  %s365_s10 = scalar_lea.vmem %s655_s12, %s253_s26 [#allocation4] }
  0x28   : > { %v214_v6 = vld [vmem:[%s198_s19] sm:$0xff]  ;;  %v215_v7 = vld [vmem:[%s198_s19 + $0x8] sm:$0x7]  ;;  %205 = vst [vmem:[%s655_s12] sm:$0x1] %v201_v3  ;;  %206 = vst [vmem:[%s655_s12 + $0x10] sm:$0x1] %v202_v4 }
  0x29   : > { %207 = vst [vmem:[%s655_s12 + $0x20] sm:$0x1] %v203_v5  ;;  %v204_v8 = vld [vmem:[%s191_s16 + $0x3] sm:$0x1]  ;;  %222 = vst [vmem:[%s655_s12 + $0x3] sm:$0xff] %v214_v6  ;;  %v216_v10 = vld [vmem:[%s198_s19 + $0x10] sm:$0xff] }
  0x2a   : > { %223 = vst [vmem:[%s655_s12 + $0xb] sm:$0x7] %v215_v7  ;;  %208 = vst [vmem:[%s655_s12 + $0x30] sm:$0x1] %v204_v8  ;;  %v217_v11 = vld [vmem:[%s198_s19 + $0x18] sm:$0x7] }
  0x2b   : > { %v218_v12 = vld [vmem:[%s198_s19 + $0x20] sm:$0xff]  ;;  %224 = vst [vmem:[%s655_s12 + $0x13] sm:$0xff] %v216_v10  ;;  %225 = vst [vmem:[%s655_s12 + $0x1b] sm:$0x7] %v217_v11  ;;  %v219_v13 = vld [vmem:[%s198_s19 + $0x28] sm:$0x7] }
  0x2c   : > { %226 = vst [vmem:[%s655_s12 + $0x23] sm:$0xff] %v218_v12  ;;  %v220_v14 = vld [vmem:[%s198_s19 + $0x30] sm:$0xff]  ;;  %v221_v15 = vld [vmem:[%s198_s19 + $0x38] sm:$0x7]  ;;  %227 = vst [vmem:[%s655_s12 + $0x2b] sm:$0x7] %v219_v13 }
  0x2d   : > { %228 = vst [vmem:[%s655_s12 + $0x33] sm:$0xff] %v220_v14  ;;  %229 = vst [vmem:[%s655_s12 + $0x3b] sm:$0x7] %v221_v15  ;;  %s273_s11 = sld [smem:[#allocation3 + %s272_s9]]  ;;  %s292_s13 = sadd.s32 3, %s643_s6 }
  0x2e   : > { %s293_s14 = sld [smem:[#allocation3 + %s292_s13]]  ;;  %s440_s6 = sshll.u32 %s614_s23, 10 }
  0x2f   : > { %s327_s16 = sshll.u32 %s655_s12, 4  ;;  %s714_s19 = scalar_lea.hbm %s770_s4, %s440_s6  ;;  %s719_s16 = int_to_ptr.vmem [resolvable:$true] %s327_s16 }
  0x30   : > { %s725_s23 = scalar_lea.sflag [#allocation5], %s185_s5  ;;  %s495_s26 = scalar_lea.vmem %s719_s16, 1024 }
  0x31   : > { %v237_v17 = vld [vmem:[%s655_s12 + $0xd] sm:$0x7]  ;;  %v236_v18 = vld [vmem:[%s655_s12 + $0x5] sm:$0xff]  ;;  %p496_p2 = scmp.ne.s32.totalorder %s719_s16, %s495_s26 }
  0x32   : > { %v246_v20 = vsel %vm240_vm1, %v215_v7, %v237_v17  ;;  %v245_v21 = vsel %vm239_vm0, %v214_v6, %v236_v18 }
  0x33   : > { %248 = vst [vmem:[%s655_s12 + $0xd] sm:$0x7] %v246_v20  ;;  %247 = vst [vmem:[%s655_s12 + $0x5] sm:$0xff] %v245_v21  ;;  %v277_v27 = vstv %s273_s11  ;;  %s367_s15 = scalar_lea.vmem %s655_s12, %s273_s11 [#allocation4]  ;;  %p497_p3 = pnand %p496_p2, %p631_p10 }
  0x34   : > { %416 = vst [vmem:[%s363_s27 + $0x3] sm:$0x3] %v230_v19  ;;  %vm278_vm4 = vcmp.ge.s32.totalorder %v661_v2, %v277_v27  ;;  %vm279_vm5 = vcmp.ge.s32.totalorder %v233_v9, %v277_v27  ;;  %v297_v32 = vstv %s293_s14  ;;  %s369_s24 = scalar_lea.vmem %s655_s12, %s293_s14 [#allocation4]  ;;  %s562_s27 = smov [#allocation4]  }
  0x35   : > { %vm298_vm6 = vcmp.ge.s32.totalorder %v661_v2, %v297_v32  ;;  %vm299_vm7 = vcmp.ge.s32.totalorder %v233_v9, %v297_v32  ;;  %p498_p4 = pneg %p497_p3  ;;  %s499_s7 = sshll.u32 %s562_s27, 4  ;;  %s500_s7 = int_to_ptr.vmem [resolvable:$false] %s499_s7 }
  0x36   : > { %s501_s8 = scalar_lea.vmem %s500_s7, 2048  ;;  %p502_p5 = scmp.lt.s32.totalorder %s719_s16, %s500_s7 }
  0x37   : > { %p503_p6 = scmp.lt.s32.totalorder %s501_s8, %s495_s26 }
  0x39   : > { %p504_p7 = por %p503_p6, %p502_p5 }
  0x3b   : > { %v417_v23 = vld [vmem:[%s655_s12 + $0x15] sm:$0xff]  ;;  %v418_v24 = vld [vmem:[%s655_s12 + $0x1d] sm:$0x7]  ;;  %p505_p8 = pnand %p504_p7, %p498_p4 }
  0x3c   : > { %v264_v25 = vsel %vm258_vm2, %v216_v10, %v417_v23  ;;  %v265_v26 = vsel %vm259_vm3, %v217_v11, %v418_v24 }
  0x3d   : > { %419 = vst [vmem:[%s655_s12 + $0x15] sm:$0xff] %v264_v25  ;;  %420 = vst [vmem:[%s655_s12 + $0x1d] sm:$0x7] %v265_v26 }
  0x3e   : > { %421 = vst [vmem:[%s365_s10 + $0x13] sm:$0x3] %v230_v19 }
  0x45   : > { %v422_v28 = vld [vmem:[%s655_s12 + $0x25] sm:$0xff]  ;;  %v423_v29 = vld [vmem:[%s655_s12 + $0x2d] sm:$0x7] }
  0x46   : > { %v284_v30 = vsel %vm278_vm4, %v218_v12, %v422_v28  ;;  %v285_v31 = vsel %vm279_vm5, %v219_v13, %v423_v29 }
  0x47   : > { %424 = vst [vmem:[%s655_s12 + $0x25] sm:$0xff] %v284_v30  ;;  %425 = vst [vmem:[%s655_s12 + $0x2d] sm:$0x7] %v285_v31 }
  0x48   : > { %426 = vst [vmem:[%s367_s15 + $0x23] sm:$0x3] %v230_v19 }
  0x4f   : > { %v427_v33 = vld [vmem:[%s655_s12 + $0x35] sm:$0xff]  ;;  %v428_v34 = vld [vmem:[%s655_s12 + $0x3d] sm:$0x7] }
  0x50   : > { %v304_v35 = vsel %vm298_vm6, %v220_v14, %v427_v33  ;;  %v305_v36 = vsel %vm299_vm7, %v221_v15, %v428_v34 }
  0x51   : > { %429 = vst [vmem:[%s655_s12 + $0x35] sm:$0xff] %v304_v35  ;;  %430 = vst [vmem:[%s655_s12 + $0x3d] sm:$0x7] %v305_v36 }
  0x52   : > { %431 = vst [vmem:[%s369_s24 + $0x33] sm:$0x3] %v230_v19 }
  0x53   : > { %508 = shalt.err (!%p505_p8)
}
  0x54   : > { %s509_s5 = scalar_lea.hbm %s714_s19, 1024  ;;  %s513_s11 = scalar_lea.hbm %s770_s4, 2048 }
  0x55   : > { %p510_p9 = scmp.ne.s32.totalorder %s714_s19, %s509_s5  ;;  %p514_p0 = scmp.lt.u32.totalorder %s714_s19, %s770_s4 }
  0x56   : > { %p515_p1 = scmp.lt.u32.totalorder %s513_s11, %s509_s5  ;;  %p517_p3 = scmp.lt.u32.totalorder %s509_s5, %s714_s19 }
  0x57   : > { %p511_p12 = pnand %p510_p9, %p631_p10 }
  0x58   : > { %p516_p2 = por %p515_p1, %p514_p0 }
  0x59   : > { %p512_p13 = pneg %p511_p12 }
  0x5a   : > { %p518_p4 = por %p517_p3, %p516_p2 }
  0x5c   : > { %p519_p5 = pnand %p518_p4, %p512_p13 }
  0x5e   : > { %522 = shalt.err (!%p519_p5)
}
  0x5f   : > { %s563_s14 = smov 128   ;;  %s564_s15 = smov 8  }
  0x60   : > { %441 = dma.vmem_to_hbm [thread:$0]  (%p631_p10), %s719_s16, 1024, %s714_s19, %s725_s23, %s563_s14, %s563_s14, %s564_s15  }
  0x61 PF: > { %p447_p6 = scmp.ge.s32.totalorder %s559_s22, 2  ;;  %s342_s6 = sand.u32 1, %s547_s20  }
  0x62   : > { %s343_s17 = scalar_lea.sflag [#allocation5], %s342_s6 }
  0x63   : > { %p444_p7 = pnand %p447_p6, %p635_p11 }
  0x65   : > { %542 = dma.done.wait (!%p444_p7), %s343_s17, 1024  }
  0x66   : > { %544 = vsyncadd (!%p444_p7), %s343_s17, 4294966272  ;;  %p20_p8 = scmp.ge.s32.totalorder %s618_s25, 4   ;;  %s773_s20 = smov %s551_s21 }
  0x67   : > { %s774_s21 = smov %s555_s0  ;;  %s775_s0 = smov %s629_s28 }
  0x68   : > { %s776_s22 = smov %s618_s25  ;;  %22 = sbr.rel (!%p20_p8) target bundleno = 18 (0x12), region = 77 }
  0x6f   :  { %348 = vsyncpa [#allocation5], 1 }
  0x70   :  { %350 = vsyncpa [#allocation5 + $0x1], 1 }

</bundles_post_ra>
